<compile_context>
chip_gen: v7x
topology: tpu7x:2x2x1
jax: 0.10.0
libtpu: 0.0.40
codegen_flags: <defaults>
</compile_context>

<pallas_src>
import functools

import jax
import jax.numpy as jnp
from jax.experimental import pallas as pl
from jax.experimental.pallas import tpu as pltpu


IN_FEATURES = 2 * 4 * 9     # 72
OUT_FEATURES = 36

MAX_TILE_B = 4096           # rows per batch tile; ~2.5 KB VMEM/row total
SPLIT_THRESHOLD_B = 2048    # above this, force >=2 grid steps (v7x megacore)


def _round_up(n, m):
    return ((n + m - 1) // m) * m


def _cdiv(a, b):
    return (a + b - 1) // b


def _choose_tile(B):
    """Equal-sized batch tiles (multiple of 8), capped at MAX_TILE_B.

    Forces at least two grid steps once the batch is large enough so that
    dimension_semantics=("parallel",) actually shards across v7x's two
    TensorCores instead of leaving one idle.
    """
    B8 = _round_up(max(B, 1), 8)
    n_tiles = _cdiv(B8, MAX_TILE_B)
    if B8 >= SPLIT_THRESHOLD_B:
        n_tiles = max(n_tiles, 2)
    tile_b = _round_up(_cdiv(B8, n_tiles), 8)
    Bp = _round_up(B8, tile_b)
    return tile_b, Bp


# ----------------------------------------------------------------------------
# Fused kernel
# ----------------------------------------------------------------------------
def _fused_mlp_kernel(num_hidden, *refs):
    """refs = [x, w_in, b_in, (w_h, b_h)*num_hidden, w_out, b_out, out, h_scratch]."""
    x_ref = refs[0]
    w_in_ref, b_in_ref = refs[1], refs[2]
    hid = refs[3:3 + 2 * num_hidden]
    w_out_ref, b_out_ref = refs[3 + 2 * num_hidden], refs[4 + 2 * num_hidden]
    o_ref = refs[5 + 2 * num_hidden]
    h_ref = refs[6 + 2 * num_hidden]            # VMEM scratch (tile_b, U) bf16

    x = x_ref[...]                              # (tile_b, 72) f32

    # in_layer: bf16 operands into the MXU, f32 accumulate / bias / relu,
    # then store the activation in bf16 (the next matmul consumes bf16 anyway).
    h = jnp.dot(x.astype(jnp.bfloat16), w_in_ref[...],
                preferred_element_type=jnp.float32)
    h_ref[...] = jnp.maximum(h + b_in_ref[...], 0.0).astype(jnp.bfloat16)

    # hidden layers (num_hidden is static -> unrolled at trace time).
    for l in range(num_hidden):
        w_ref, b_ref = hid[2 * l], hid[2 * l + 1]
        h = jnp.dot(h_ref[...], w_ref[...], preferred_element_type=jnp.float32)
        h_ref[...] = jnp.maximum(h + b_ref[...], 0.0).astype(jnp.bfloat16)

    # out_layer + penalty.  Channel-sum of the (B,2,4,9) input equals
    # x_flat[:, :36] + x_flat[:, 36:] of the flat block already in VMEM.
    # (The lane-36 slice lowers to an XLU rotate, which has slack here.)
    y = jnp.dot(h_ref[...], w_out_ref[...], preferred_element_type=jnp.float32)
    y = y + b_out_ref[...]
    penalty = (x[:, :OUT_FEATURES] + x[:, OUT_FEATURES:]) * (-1000.0)
    o_ref[...] = (y + penalty).astype(o_ref.dtype)


# ----------------------------------------------------------------------------
# Wrapper
# ----------------------------------------------------------------------------
@jax.jit
def forward(params, x):
    """x: (B, 2, 4, 9) float32 -> (B, 36) float32, one fused pallas_call."""
    B = x.shape[0]
    xf = x.reshape(B, IN_FEATURES).astype(jnp.float32)

    tile_b, Bp = _choose_tile(B)
    if Bp != B:
        xf = jnp.pad(xf, ((0, Bp - B), (0, 0)))

    w_in, b_in = params["in_layer"]
    hidden = params["hidden"]
    w_out, b_out = params["out_layer"]
    num_hidden = len(hidden)
    num_units = w_in.shape[1]

    # The bf16 scratch is sized from the in_layer width; require a uniform
    # hidden stack so the scratch is never reused at the wrong size.
    for (wh, bh) in hidden:
        assert wh.shape == (num_units, num_units) and bh.shape == (1, num_units)
    assert w_out.shape == (num_units, OUT_FEATURES)

    def resident_spec(shape):
        # Constant index_map -> fetched once; single-buffered (no dead 2nd buf).
        return pl.BlockSpec(shape, lambda i: (0, 0),
                            pipeline_mode=pl.Buffered(buffer_count=1))

    operands = [xf, w_in, b_in]
    in_specs = [
        pl.BlockSpec((tile_b, IN_FEATURES), lambda i: (i, 0)),   # x tile
        resident_spec(w_in.shape),
        resident_spec(b_in.shape),
    ]
    for (wh, bh) in hidden:
        operands += [wh, bh]
        in_specs += [resident_spec(wh.shape), resident_spec(bh.shape)]
    operands += [w_out, b_out]
    in_specs += [resident_spec(w_out.shape), resident_spec(b_out.shape)]

    out = pl.pallas_call(
        functools.partial(_fused_mlp_kernel, num_hidden),
        out_shape=jax.ShapeDtypeStruct((Bp, OUT_FEATURES), jnp.float32),
        grid_spec=pltpu.PrefetchScalarGridSpec(
            num_scalar_prefetch=0,
            grid=(Bp // tile_b,),
            in_specs=in_specs,
            out_specs=pl.BlockSpec((tile_b, OUT_FEATURES), lambda i: (i, 0)),
            scratch_shapes=[pltpu.VMEM((tile_b, num_units), jnp.bfloat16)],
        ),
        compiler_params=pltpu.CompilerParams(
            dimension_semantics=("parallel",),
            # ~10.5 MB @ tile_b=4096 (x/out double-buffered + bf16 scratch):
            # clears v5e's 16 MiB default with headroom; no-op on v6e/v7x.
            vmem_limit_bytes=32 * 1024 * 1024),
    )(*operands)
    return out[:B]


# ----------------------------------------------------------------------------
# Parameters (PyTorch nn.Linear default init, stored MXU-ready)
# ----------------------------------------------------------------------------
def init_params(key, num_layers=1, num_units=200):
    """Weights stored pre-transposed (in, out) in bf16; biases f32 (1, out).

    Note: the MXU pads the hidden width to the next multiple of 128 anyway,
    so e.g. num_units=256 costs the same MXU time as 200; default kept at 200
    to match the PyTorch spec.
    """
    def linear_init(k, out_f, in_f):
        k_w, k_b = jax.random.split(k)
        bound = 1.0 / jnp.sqrt(in_f)
        w = jax.random.uniform(k_w, (out_f, in_f), jnp.float32, -bound, bound)
        b = jax.random.uniform(k_b, (out_f,), jnp.float32, -bound, bound)
        return jnp.transpose(w).astype(jnp.bfloat16), b.reshape(1, out_f)

    keys = jax.random.split(key, num_layers + 1)
    return {
        "in_layer": linear_init(keys[0], num_units, IN_FEATURES),
        "hidden": [linear_init(keys[1 + i], num_units, num_units)
                   for i in range(num_layers - 1)],
        "out_layer": linear_init(keys[num_layers], OUT_FEATURES, num_units),
    }


# ----------------------------------------------------------------------------
# Pure-JAX reference (same bf16-weight / f32-accumulate recipe) for checking.
# NOTE: this validates the kernel against the bf16 recipe, not full-f32 torch.
# ----------------------------------------------------------------------------
def forward_ref(params, x):
    B = x.shape[0]
    h = x.reshape(B, IN_FEATURES)
    wT, b = params["in_layer"]
    h = jax.nn.relu(jnp.dot(h.astype(jnp.bfloat16), wT,
                            preferred_element_type=jnp.float32) + b)
    for wTh, bh in params["hidden"]:
        h = jax.nn.relu(jnp.dot(h.astype(jnp.bfloat16), wTh,
                                preferred_element_type=jnp.float32) + bh)
    wTo, bo = params["out_layer"]
    y = jnp.dot(h.astype(jnp.bfloat16), wTo,
                preferred_element_type=jnp.float32) + bo
    return y + x.sum(axis=1).reshape(B, OUT_FEATURES) * (-1000.0)


if __name__ == "__main__":
    key = jax.random.PRNGKey(0)
    k_p1, k_p2, k_x1, k_x2 = jax.random.split(key, 4)

    # Config 1: one hidden layer (num_layers=2, num_units=200), batch=2.
    B = 2
    x = jax.random.normal(k_x1, (B, 2, 4, 9), dtype=jnp.float32)
    params = init_params(k_p1, num_layers=2, num_units=200)
    out = jax.block_until_ready(forward(params, x))
    ref = forward_ref(params, x)
    assert out.shape == (B, OUT_FEATURES), out.shape
    assert jnp.allclose(out, ref, atol=1e-2, rtol=1e-2), (
        float(jnp.max(jnp.abs(out - ref))))

    # Config 2: no hidden layers (num_layers=1) exercises the empty-hidden path.
    params1 = init_params(k_p2, num_layers=1, num_units=200)
    out1 = jax.block_until_ready(forward(params1, x))
    ref1 = forward_ref(params1, x)
    assert jnp.allclose(out1, ref1, atol=1e-2, rtol=1e-2), (
        float(jnp.max(jnp.abs(out1 - ref1))))

    # Config 3: non-multiple-of-8 batch exercises the padding / tiling path.
    B3 = 12
    x3 = jax.random.normal(k_x2, (B3, 2, 4, 9), dtype=jnp.float32)
    out3 = jax.block_until_ready(forward(params, x3))
    ref3 = forward_ref(params, x3)
    assert out3.shape == (B3, OUT_FEATURES), out3.shape
    assert jnp.allclose(out3, ref3, atol=1e-2, rtol=1e-2), (
        float(jnp.max(jnp.abs(out3 - ref3))))

    print("KERNEL_OK")
</pallas_src>

<mosaic_0001>
module attributes {stable_mosaic.version = 11 : i64} {
  func.func @_fused_mlp_kernel(%arg0: i32, %arg1: memref<8x72xf32, #tpu.memory_space<vmem>>, %arg2: memref<72x200xbf16, #tpu.memory_space<vmem>>, %arg3: memref<1x200xf32, #tpu.memory_space<vmem>>, %arg4: memref<200x200xbf16, #tpu.memory_space<vmem>>, %arg5: memref<1x200xf32, #tpu.memory_space<vmem>>, %arg6: memref<200x36xbf16, #tpu.memory_space<vmem>>, %arg7: memref<1x36xf32, #tpu.memory_space<vmem>>, %arg8: memref<8x36xf32, #tpu.memory_space<vmem>>, %arg9: memref<8x200xbf16, #tpu.memory_space<vmem>>) attributes {dimension_semantics = [#tpu.dimension_semantics<parallel>], iteration_bounds = array<i64: 1>, scalar_prefetch = 0 : i64, scratch_operands = 1 : i64, tpu.core_type = #tpu.core_type<tc>, window_params = [{transform_indices = @transform_0, window_bounds = array<i64: 8, 72>}, {pipeline_mode = #tpu.pipeline_mode<synchronous>, transform_indices = @transform_1, window_bounds = array<i64: 72, 200>}, {pipeline_mode = #tpu.pipeline_mode<synchronous>, transform_indices = @transform_2, window_bounds = array<i64: 1, 200>}, {pipeline_mode = #tpu.pipeline_mode<synchronous>, transform_indices = @transform_3, window_bounds = array<i64: 200, 200>}, {pipeline_mode = #tpu.pipeline_mode<synchronous>, transform_indices = @transform_4, window_bounds = array<i64: 1, 200>}, {pipeline_mode = #tpu.pipeline_mode<synchronous>, transform_indices = @transform_5, window_bounds = array<i64: 200, 36>}, {pipeline_mode = #tpu.pipeline_mode<synchronous>, transform_indices = @transform_6, window_bounds = array<i64: 1, 36>}, {transform_indices = @transform_7, window_bounds = array<i64: 8, 36>}]} {
    %c0 = arith.constant 0 : index
    %c0_0 = arith.constant 0 : index
    %0 = vector.load %arg1[%c0, %c0_0] : memref<8x72xf32, #tpu.memory_space<vmem>>, vector<8x72xf32>
    %1 = arith.truncf %0 : vector<8x72xf32> to vector<8x72xbf16>
    %c0_1 = arith.constant 0 : index
    %c0_2 = arith.constant 0 : index
    %2 = vector.load %arg2[%c0_1, %c0_2] : memref<72x200xbf16, #tpu.memory_space<vmem>>, vector<72x200xbf16>
    %cst = arith.constant dense<0.000000e+00> : vector<8x200xf32>
    %3 = tpu.matmul %1, %2, %cst {dimension_numbers = #tpu.dot_dimension_numbers<[1], [0], [0], [1], [0, 0, 1, 1], [], []>} : vector<8x72xbf16>, vector<72x200xbf16>, vector<8x200xf32> -> vector<8x200xf32>
    %c0_3 = arith.constant 0 : index
    %c0_4 = arith.constant 0 : index
    %4 = vector.load %arg3[%c0_3, %c0_4] : memref<1x200xf32, #tpu.memory_space<vmem>>, vector<1x200xf32>
    %5 = vector.broadcast %4 : vector<1x200xf32> to vector<8x200xf32>
    %6 = arith.addf %3, %5 : vector<8x200xf32>
    %cst_5 = arith.constant 0.000000e+00 : f32
    %7 = vector.broadcast %cst_5 : f32 to vector<8x200xf32>
    %8 = arith.maximumf %6, %7 : vector<8x200xf32>
    %9 = arith.truncf %8 : vector<8x200xf32> to vector<8x200xbf16>
    %c0_6 = arith.constant 0 : index
    %c0_7 = arith.constant 0 : index
    %10 = vector.load %arg9[%c0_6, %c0_7] : memref<8x200xbf16, #tpu.memory_space<vmem>>, vector<8x200xbf16>
    tpu.vector_store %arg9[%c0_6, %c0_7], %9 {strides = array<i32>} : memref<8x200xbf16, #tpu.memory_space<vmem>>, vector<8x200xbf16>,
    %c0_8 = arith.constant 0 : index
    %c0_9 = arith.constant 0 : index
    %11 = vector.load %arg9[%c0_8, %c0_9] : memref<8x200xbf16, #tpu.memory_space<vmem>>, vector<8x200xbf16>
    %c0_10 = arith.constant 0 : index
    %c0_11 = arith.constant 0 : index
    %12 = vector.load %arg4[%c0_10, %c0_11] : memref<200x200xbf16, #tpu.memory_space<vmem>>, vector<200x200xbf16>
    %cst_12 = arith.constant dense<0.000000e+00> : vector<8x200xf32>
    %13 = tpu.matmul %11, %12, %cst_12 {dimension_numbers = #tpu.dot_dimension_numbers<[1], [0], [0], [1], [0, 0, 1, 1], [], []>} : vector<8x200xbf16>, vector<200x200xbf16>, vector<8x200xf32> -> vector<8x200xf32>
    %c0_13 = arith.constant 0 : index
    %c0_14 = arith.constant 0 : index
    %14 = vector.load %arg5[%c0_13, %c0_14] : memref<1x200xf32, #tpu.memory_space<vmem>>, vector<1x200xf32>
    %15 = vector.broadcast %14 : vector<1x200xf32> to vector<8x200xf32>
    %16 = arith.addf %13, %15 : vector<8x200xf32>
    %cst_15 = arith.constant 0.000000e+00 : f32
    %17 = vector.broadcast %cst_15 : f32 to vector<8x200xf32>
    %18 = arith.maximumf %16, %17 : vector<8x200xf32>
    %19 = arith.truncf %18 : vector<8x200xf32> to vector<8x200xbf16>
    %c0_16 = arith.constant 0 : index
    %c0_17 = arith.constant 0 : index
    %20 = vector.load %arg9[%c0_16, %c0_17] : memref<8x200xbf16, #tpu.memory_space<vmem>>, vector<8x200xbf16>
    tpu.vector_store %arg9[%c0_16, %c0_17], %19 {strides = array<i32>} : memref<8x200xbf16, #tpu.memory_space<vmem>>, vector<8x200xbf16>,
    %c0_18 = arith.constant 0 : index
    %c0_19 = arith.constant 0 : index
    %21 = vector.load %arg9[%c0_18, %c0_19] : memref<8x200xbf16, #tpu.memory_space<vmem>>, vector<8x200xbf16>
    %c0_20 = arith.constant 0 : index
    %c0_21 = arith.constant 0 : index
    %22 = vector.load %arg6[%c0_20, %c0_21] : memref<200x36xbf16, #tpu.memory_space<vmem>>, vector<200x36xbf16>
    %cst_22 = arith.constant dense<0.000000e+00> : vector<8x36xf32>
    %23 = tpu.matmul %21, %22, %cst_22 {dimension_numbers = #tpu.dot_dimension_numbers<[1], [0], [0], [1], [0, 0, 1, 1], [], []>} : vector<8x200xbf16>, vector<200x36xbf16>, vector<8x36xf32> -> vector<8x36xf32>
    %c0_23 = arith.constant 0 : index
    %c0_24 = arith.constant 0 : index
    %24 = vector.load %arg7[%c0_23, %c0_24] : memref<1x36xf32, #tpu.memory_space<vmem>>, vector<1x36xf32>
    %25 = vector.broadcast %24 : vector<1x36xf32> to vector<8x36xf32>
    %26 = arith.addf %23, %25 : vector<8x36xf32>
    %27 = vector.extract_strided_slice %0 {offsets = [0, 0], sizes = [8, 36], strides = [1, 1]} : vector<8x72xf32> to vector<8x36xf32>
    %28 = vector.extract_strided_slice %0 {offsets = [0, 36], sizes = [8, 36], strides = [1, 1]} : vector<8x72xf32> to vector<8x36xf32>
    %29 = arith.addf %27, %28 : vector<8x36xf32>
    %cst_25 = arith.constant -1.000000e+03 : f32
    %30 = vector.broadcast %cst_25 : f32 to vector<8x36xf32>
    %31 = arith.mulf %29, %30 : vector<8x36xf32>
    %32 = arith.addf %26, %31 : vector<8x36xf32>
    %c0_26 = arith.constant 0 : index
    %c0_27 = arith.constant 0 : index
    %33 = vector.load %arg8[%c0_26, %c0_27] : memref<8x36xf32, #tpu.memory_space<vmem>>, vector<8x36xf32>
    tpu.vector_store %arg8[%c0_26, %c0_27], %32 {strides = array<i32>} : memref<8x36xf32, #tpu.memory_space<vmem>>, vector<8x36xf32>,
    return
  }
  func.func @transform_0(%arg0: i32) -> (i32, i32) {
    %c0_i32 = arith.constant 0 : i32
    %c0_i32_0 = arith.constant 0 : i32
    return %arg0, %c0_i32 : i32, i32
  }
  func.func @transform_1(%arg0: i32) -> (i32, i32) {
    %c0_i32 = arith.constant 0 : i32
    %c0_i32_0 = arith.constant 0 : i32
    %c0_i32_1 = arith.constant 0 : i32
    return %c0_i32, %c0_i32_0 : i32, i32
  }
  func.func @transform_2(%arg0: i32) -> (i32, i32) {
    %c0_i32 = arith.constant 0 : i32
    %c0_i32_0 = arith.constant 0 : i32
    %c0_i32_1 = arith.constant 0 : i32
    return %c0_i32, %c0_i32_0 : i32, i32
  }
  func.func @transform_3(%arg0: i32) -> (i32, i32) {
    %c0_i32 = arith.constant 0 : i32
    %c0_i32_0 = arith.constant 0 : i32
    %c0_i32_1 = arith.constant 0 : i32
    return %c0_i32, %c0_i32_0 : i32, i32
  }
  func.func @transform_4(%arg0: i32) -> (i32, i32) {
    %c0_i32 = arith.constant 0 : i32
    %c0_i32_0 = arith.constant 0 : i32
    %c0_i32_1 = arith.constant 0 : i32
    return %c0_i32, %c0_i32_0 : i32, i32
  }
  func.func @transform_5(%arg0: i32) -> (i32, i32) {
    %c0_i32 = arith.constant 0 : i32
    %c0_i32_0 = arith.constant 0 : i32
    %c0_i32_1 = arith.constant 0 : i32
    return %c0_i32, %c0_i32_0 : i32, i32
  }
  func.func @transform_6(%arg0: i32) -> (i32, i32) {
    %c0_i32 = arith.constant 0 : i32
    %c0_i32_0 = arith.constant 0 : i32
    %c0_i32_1 = arith.constant 0 : i32
    return %c0_i32, %c0_i32_0 : i32, i32
  }
  func.func @transform_7(%arg0: i32) -> (i32, i32) {
    %c0_i32 = arith.constant 0 : i32
    %c0_i32_0 = arith.constant 0 : i32
    return %arg0, %c0_i32 : i32, i32
  }
}

</mosaic_0001>

<bundles_post_ra>
// kernel: forward.1
= control target key start
LH: loop header
LB: loop body
LE: loop exit
PB: predicated region body
PF: predicated region fallthrough
CT: control target
= control target key end

     0   :  { %12 = vsyncpa [#allocation4], 0  ;;  %s739_s24 = smov [#allocation3]   ;;  %s914_s0 = inlined_call_operand.vmem [shape: f32[8,72], index: 0, kind: input, shape index: {}]   ;;  %s915_s1 = inlined_call_operand.vmem [shape: bf16[72,200], index: 1, kind: input, shape index: {}]   ;;  %s916_s2 = inlined_call_operand.vmem [shape: f32[1,200], index: 2, kind: input, shape index: {}]   ;;  %s917_s3 = inlined_call_operand.hbm [shape: bf16[200,200], index: 3, kind: input, shape index: {}]   ;;  %s918_s4 = inlined_call_operand.vmem [shape: f32[1,200], index: 4, kind: input, shape index: {}]   ;;  %s919_s5 = inlined_call_operand.vmem [shape: bf16[200,36], index: 5, kind: input, shape index: {}]   ;;  %s920_s6 = inlined_call_operand.vmem [shape: f32[1,36], index: 6, kind: input, shape index: {}]   ;;  %s921_s7 = inlined_call_operand.vmem [shape: f32[8,36], index: 7, kind: output, shape index: {}]  }
   0x1   :  { %s24_s25 = sshll.u32 %s739_s24, 4  ;;  %s715_s28 = scalar_lea.hbm %s917_s3, 3200  ;;  %s25_s25 = int_to_ptr.vmem [resolvable:$true] %s24_s25 }
   0x2   :  { %p716_p0 = scmp.ne.s32.totalorder %s917_s3, %s715_s28  ;;  %p719_p1 = scmp.lt.u32.totalorder %s715_s28, %s917_s3 }
   0x4   :  { %p721_p2 = pnand %p719_p1, %p716_p0 }
   0x6   :  { %724 = shalt.err (!%p721_p2)
}
   0x7   :  { %s725_s10 = scalar_lea.vmem %s25_s25, 3200  ;;  %p730_p4 = scmp.lt.s32.totalorder %s25_s25, %s25_s25 }
   0x8   :  { %p726_p3 = scmp.ne.s32.totalorder %s25_s25, %s725_s10  ;;  %p731_p5 = scmp.lt.s32.totalorder %s725_s10, %s725_s10 }
   0xa   :  { %p732_p6 = por %p731_p5, %p730_p4 }
   0xc   :  { %p733_p7 = pnand %p732_p6, %p726_p3 }
   0xe   :  { %736 = shalt.err (!%p733_p7)
}
   0xf   :  { %s740_s11 = smov 128   ;;  %s741_s12 = smov 8  }
  0x10   :  { %30 = dma.hbm_to_vmem [thread:$0]  %s917_s3, 3200, %s25_s25, [#allocation4], %s740_s11, %s740_s11, %s741_s12  }
  0x11   :  { %737 = dma.done.wait [#allocation4], 3200  }
  0x12   :  { %738 = vsyncadd [#allocation4], 4294964096  ;;  %v742_v0 = vmov 0   ;;  %v646_v1 = vld [vmem:[%s915_s1 + $0x4] ss:$8 sps:$4 sm:$0xff]   ;;  %vm113_vm0 = vcmask 1043456   ;;  %v54_v51 = vlaneseq }
  0x13   :  { %152 = vmatprep.mubr.bf16.mxu0 %v742_v0  ;;  %v648_v2 = vld [vmem:[%s915_s1] ss:$8 sps:$4 sm:$0xff]   ;;  %120 = vmatprep.subr.bf16.mxu0 %v646_v1  ;;  %v649_v3 = vld [vmem:[%s915_s1 + $0x14] ss:$8 sps:$4 sm:$0xff]   ;;  %v651_v4 = vld [vmem:[%s915_s1 + $0x10] ss:$8 sps:$4 sm:$0xff]  }
  0x14   :  { %121 = vmatpush1.bf16.msra.mxu0 %v648_v2  ;;  %v652_v5 = vld [vmem:[%s915_s1 + $0x24] ss:$8 sps:$4 sm:$0xff]   ;;  %v654_v6 = vld [vmem:[%s915_s1 + $0x20] ss:$8 sps:$4 sm:$0xff]   ;;  %v655_v9 = vld [vmem:[%s915_s1 + $0x34] ss:$8 sps:$4 sm:$0xff]  }
  0x15   :  { %122 = vmatprep.subr.bf16.mxu0 %v649_v3  ;;  %v660_v7 = vld [vmem:[#allocation3 + $0x4] ss:$8 sps:$4 sm:$0xff]   ;;  %v662_v8 = vld [vmem:[#allocation3] ss:$8 sps:$4 sm:$0xff]   ;;  %v663_v10 = vld [vmem:[#allocation3 + $0x14] ss:$8 sps:$4 sm:$0xff]  }
  0x16   :  { %352 = vmatprep.subr.bf16.mxu1 %v660_v7  ;;  %v51_v11 = vld [vmem:[%s915_s1 + $0x40] sm:$0xff]  ;;  %v666_v13 = vld [vmem:[#allocation3 + $0x24] ss:$8 sps:$4 sm:$0xff]   ;;  %v657_v14 = vld [vmem:[%s915_s1 + $0x30] ss:$8 sps:$4 sm:$0xff]   ;;  %vm109_vm1 = vcmask 588800  }
  0x17   :  { %353 = vmatpush1.bf16.msra.mxu1 %v662_v8  ;;  %v665_v12 = vld [vmem:[#allocation3 + $0x10] ss:$8 sps:$4 sm:$0xff]   ;;  %v587_v15 = vcombine.high %v51_v11, %v51_v11  ;;  %v586_v16 = vcombine.low %v51_v11, %v51_v11  ;;  %v668_v17 = vld [vmem:[#allocation3 + $0x20] ss:$8 sps:$4 sm:$0xff]   ;;  %v669_v18 = vld [vmem:[#allocation3 + $0x34] ss:$8 sps:$4 sm:$0xff]  }
  0x18   :  { %123 = vmatpush1.bf16.msra.mxu0 %v651_v4  ;;  %354 = vmatprep.subr.bf16.mxu1 %v663_v10  ;;  %v827_v19 = vld [vmem:[%s914_s0] sm:$0xff]  ;;  %v672_v22 = vld [vmem:[#allocation3 + $0x44] ss:$8 sps:$4 sm:$0xff]   ;;  %v674_v24 = vld [vmem:[#allocation3 + $0x40] ss:$8 sps:$4 sm:$0xff]   ;;  %v55_v52 = vshrl.u32 %v54_v51, 7 }
  0x19   :  { %124 = vmatprep.subr.bf16.mxu0 %v652_v5  ;;  %v115_v20 = vsel %vm113_vm0, %v586_v16, 0  ;;  %v671_v21 = vld [vmem:[#allocation3 + $0x30] ss:$8 sps:$4 sm:$0xff]   ;;  %v42_v23 = vpack.c.bf16 %v827_v19, %v827_v19  ;;  %v675_v25 = vld [vmem:[#allocation3 + $0x54] ss:$8 sps:$4 sm:$0xff]   ;;  %v199_v39 = vld [vmem:[#allocation3 + $0xc0] sm:$0xff] }
  0x1a   :  { %v677_v26 = vld [vmem:[#allocation3 + $0x50] ss:$8 sps:$4 sm:$0xff]   ;;  %v678_v27 = vld [vmem:[#allocation3 + $0x64] ss:$8 sps:$4 sm:$0xff]   ;;  %v680_v28 = vld [vmem:[#allocation3 + $0x60] ss:$8 sps:$4 sm:$0xff]   ;;  %v618_v40 = vcombine.high %v199_v39, %v199_v39  ;;  %v617_v41 = vcombine.low %v199_v39, %v199_v39 }
  0x1b   :  { %355 = vmatpush1.bf16.msra.mxu1 %v665_v12  ;;  %v681_v29 = vld [vmem:[#allocation3 + $0x74] ss:$8 sps:$4 sm:$0xff]   ;;  %v683_v30 = vld [vmem:[#allocation3 + $0x70] ss:$8 sps:$4 sm:$0xff]   ;;  %v684_v31 = vld [vmem:[#allocation3 + $0x84] ss:$8 sps:$4 sm:$0xff]  }
  0x1c   :  { %125 = vmatpush1.bf16.msra.mxu0 %v654_v6  ;;  %356 = vmatprep.subr.bf16.mxu1 %v666_v13  ;;  %v686_v32 = vld [vmem:[#allocation3 + $0x80] ss:$8 sps:$4 sm:$0xff]   ;;  %v687_v33 = vld [vmem:[#allocation3 + $0x94] ss:$8 sps:$4 sm:$0xff]   ;;  %v689_v34 = vld [vmem:[#allocation3 + $0x90] ss:$8 sps:$4 sm:$0xff]  }
  0x1d   :  { %126 = vmatprep.subr.bf16.mxu0 %v655_v9  ;;  %v690_v35 = vld [vmem:[#allocation3 + $0xa4] ss:$8 sps:$4 sm:$0xff]   ;;  %v692_v36 = vld [vmem:[#allocation3 + $0xa0] ss:$8 sps:$4 sm:$0xff]   ;;  %v693_v37 = vld [vmem:[#allocation3 + $0xb4] ss:$8 sps:$4 sm:$0xff]  }
  0x1e   :  { %v695_v38 = vld [vmem:[#allocation3 + $0xb0] ss:$8 sps:$4 sm:$0xff]   ;;  %v347_v42 = vsel %vm113_vm0, %v617_v41, 0  ;;  %v701_v44 = vld [vmem:[%s919_s5 + $0x8] sm:$0xff]   ;;  %v702_v45 = vld [vmem:[%s919_s5 + $0x10] sm:$0xff]   ;;  %v56_v53 = vsub.s32 0, %v55_v52 }
  0x1f   :  { %357 = vmatpush1.bf16.msra.mxu1 %v668_v17  ;;  %v700_v43 = vld [vmem:[%s919_s5] sm:$0xff]   ;;  %v703_v46 = vld [vmem:[%s919_s5 + $0x18] sm:$0xff]   ;;  %v705_v48 = vld [vmem:[%s919_s5 + $0x28] sm:$0xff]   ;;  %v60_v55 = vsub.s32 1, %v55_v52  ;;  %vm171_vm2 = vcmask 588804   ;;  %s743_s1 = smov 92  }
  0x20   :  { %127 = vmatpush1.bf16.msra.mxu0 %v657_v14  ;;  %358 = vmatprep.subr.bf16.mxu1 %v669_v18  ;;  %v704_v47 = vld [vmem:[%s919_s5 + $0x20] sm:$0xff]   ;;  %v706_v49 = vld [vmem:[%s919_s5 + $0x30] sm:$0xff]   ;;  %v707_v50 = vld [vmem:[%s919_s5 + $0x38] sm:$0xff]   ;;  %vm571_vm4 = vcmask 293888  }
  0x21   :  { %588 = vmatprep.subr.msk.bf16.mxu0 %vm113_vm0, %v587_v15  ;;  %v52_v54 = vld [vmem:[%s916_s2] sm:$0x3]  ;;  %vm873_vm3 = vmor %vm171_vm2, %vm113_vm0  ;;  %v709_v9 = vld [vmem:[%s919_s5 + $0x48] sm:$0xff]   ;;  %565 = vrot.lane.b32.xlu0 %v827_v19, %s743_s1 }
  0x22   :  { %v57_v56 = vrot.slane %v52_v54, %v56_v53  ;;  %v61_v57 = vrot.slane %v52_v54, %v60_v55  ;;  %v708_v8 = vld [vmem:[%s919_s5 + $0x40] sm:$0xff]   ;;  %v710_v10 = vld [vmem:[%s919_s5 + $0x50] sm:$0xff]   ;;  %v711_v11 = vld [vmem:[%s919_s5 + $0x58] sm:$0xff]  }
  0x23   :  { %359 = vmatpush1.bf16.msra.mxu1 %v671_v21  ;;  %v712_v12 = vld [vmem:[%s919_s5 + $0x60] ss:$0 sps:$4 sm:$0xff]  }
  0x24   :  { %129 = vmatpush1.bf16.msra.mxu0 %v115_v20  ;;  %360 = vmatprep.subr.bf16.mxu1 %v672_v22  ;;  %v522_v13 = vsel %vm113_vm0, %v712_v12, 0  ;;  %v200_v14 = vld [vmem:[%s918_s4] sm:$0x3] }
  0x25   :  { %524 = vmatprep.subr.bf16.mxu0 %v742_v0  ;;  %v205_v15 = vrot.slane %v200_v14, %v56_v53  ;;  %v209_v16 = vrot.slane %v200_v14, %v60_v55 }
  0x27   :  { %589 = vmatmul.mubr.msk.bf16.vlgmr.msra.gmra.mrb[0].mxu0 %vm109_vm1, %v42_v23  ;;  %361 = vmatpush1.bf16.msra.mxu1 %v674_v24 }
  0x28   :  { %362 = vmatprep.subr.bf16.mxu1 %v675_v25  ;;  %525 = vmatpush1.bf16.msra.mxu0 %v700_v43 }
  0x29   :  { %526 = vmatprep.subr.bf16.mxu0 %v742_v0 }
  0x2b   :  { %363 = vmatpush1.bf16.msra.mxu1 %v677_v26 }
  0x2c   :  { %364 = vmatprep.subr.bf16.mxu1 %v678_v27  ;;  %527 = vmatpush1.bf16.msra.mxu0 %v701_v44 }
  0x2d   :  { %528 = vmatprep.subr.bf16.mxu0 %v742_v0 }
  0x2f   :  { %365 = vmatpush1.bf16.msra.mxu1 %v680_v28 }
  0x30   :  { %366 = vmatprep.subr.bf16.mxu1 %v681_v29  ;;  %529 = vmatpush1.bf16.msra.mxu0 %v702_v45 }
  0x31   :  { %530 = vmatprep.subr.bf16.mxu0 %v742_v0 }
  0x33   :  { %367 = vmatpush1.bf16.msra.mxu1 %v683_v30 }
  0x34   :  { %368 = vmatprep.subr.bf16.mxu1 %v684_v31  ;;  %531 = vmatpush1.bf16.msra.mxu0 %v703_v46  ;;  %v622_v31 = vld [vmem:[%s920_s6] ss:$0 sm:$0xff] }
  0x35   :  { %532 = vmatprep.subr.bf16.mxu0 %v742_v0 }
  0x37   :  { %369 = vmatpush1.bf16.msra.mxu1 %v686_v32 }
  0x38   :  { %370 = vmatprep.subr.bf16.mxu1 %v687_v33  ;;  %533 = vmatpush1.bf16.msra.mxu0 %v704_v47 }
  0x39   :  { %534 = vmatprep.subr.bf16.mxu0 %v742_v0 }
  0x3b   :  { %371 = vmatpush1.bf16.msra.mxu1 %v689_v34 }
  0x3c   :  { %372 = vmatprep.subr.bf16.mxu1 %v690_v35  ;;  %535 = vmatpush1.bf16.msra.mxu0 %v705_v48 }
  0x3d   :  { %536 = vmatprep.subr.bf16.mxu0 %v742_v0 }
  0x3f   :  { %373 = vmatpush1.bf16.msra.mxu1 %v692_v36 }
  0x40   :  { %374 = vmatprep.subr.bf16.mxu1 %v693_v37  ;;  %537 = vmatpush1.bf16.msra.mxu0 %v706_v49 }
  0x41   :  { %538 = vmatprep.subr.bf16.mxu0 %v742_v0 }
  0x43   :  { %375 = vmatpush1.bf16.msra.mxu1 %v695_v38 }
  0x44   :  { %619 = vmatprep.subr.msk.bf16.mxu1 %vm113_vm0, %v618_v40  ;;  %539 = vmatpush1.bf16.msra.mxu0 %v707_v50 }
  0x45   :  { %540 = vmatprep.subr.bf16.mxu0 %v742_v0 }
  0x47   :  { %377 = vmatpush1.bf16.msra.mxu1 %v347_v42 }
  0x48   :  { %541 = vmatpush1.bf16.msra.mxu0 %v708_v8 }
  0x49   :  { %542 = vmatprep.subr.bf16.mxu0 %v742_v0 }
  0x4c   :  { %543 = vmatpush1.bf16.msra.mxu0 %v709_v9 }
  0x4d   :  { %544 = vmatprep.subr.bf16.mxu0 %v742_v0 }
  0x50   :  { %545 = vmatpush1.bf16.msra.mxu0 %v710_v10 }
  0x51   :  { %546 = vmatprep.subr.bf16.mxu0 %v742_v0 }
  0x54   :  { %547 = vmatpush1.bf16.msra.mxu0 %v711_v11 }
  0x55   :  { %548 = vmatprep.subr.bf16.mxu0 %v742_v0 }
  0x58   :  { %549 = vmatpush1.bf16.msra.mxu0 %v522_v13 }
  0x93   :  { %v566_v29 = vpop.permute.xlu0 %565 }
  0x94   :  { %v568_v30 = vadd.f32 %v566_v29, %v827_v19 }
  0x96   :  { %v569_v32 = vmul.f32 -1000.0, %v568_v30 }
  0xfa   :  { %v154_v58 = vpop.f32.mrb[0].mxu0 }
  0xfb   :  { %v155_v59 = vadd.f32 %v154_v58, %v57_v56  ;;  %v156_v60 = vpop.f32.mrb[1].mxu0 }
  0xfc   :  { %v157_v61 = vadd.f32 %v156_v60, %v61_v57  ;;  %v158_v62 = vpop.f32.mrb[2].mxu0 }
  0xfd   :  { %v161_v63 = vmax.f32 %v155_v59, 0.0  ;;  %v159_v1 = vpop.f32.mrb[3].mxu0 }
  0xfe   :  { %v162_v2 = vmax.f32 %v157_v61, 0.0 }
 0x100   :  { %v639_v4 = vpack.c.bf16 %v162_v2, %v161_v63 }
 0x102   :  { %173 = vst.msk [vmem:[#allocation2] sm:$0xff] %vm873_vm3, %v639_v4 }
 0x109   :  { %v174_v5 = vld [vmem:[#allocation2] sm:$0xff] }
 0x10a   :  { %v592_v6 = vcombine.high %v174_v5, %v174_v5  ;;  %v591_v7 = vcombine.low %v174_v5, %v174_v5 }
 0x10c   :  { %620 = vmatprep.mubr.msk.bf16.mxu1 %vm109_vm1, %v592_v6 }
 0x10d   :  { %385 = vmatmul.mubr.bf16.vlgmr.msra.gmra.mrb[0].mxu1 %v591_v7 }
 0x1e0   :  { %v386_v17 = vpop.f32.mrb[0].mxu1 }
 0x1e1   :  { %v387_v18 = vadd.f32 %v386_v17, %v205_v15  ;;  %v388_v20 = vpop.f32.mrb[1].mxu1 }
 0x1e2   :  { %v389_v21 = vadd.f32 %v388_v20, %v209_v16  ;;  %v390_v22 = vpop.f32.mrb[2].mxu1 }
 0x1e3   :  { %v393_v23 = vmax.f32 %v387_v18, 0.0  ;;  %v391_v24 = vpop.f32.mrb[3].mxu1 }
 0x1e4   :  { %v394_v0 = vmax.f32 %v389_v21, 0.0 }
 0x1e6   :  { %v640_v25 = vpack.c.bf16 %v394_v0, %v393_v23 }
 0x1e8   :  { %403 = vst.msk [vmem:[#allocation2] sm:$0xff] %vm873_vm3, %v640_v25 }
 0x1ef   :  { %v404_v26 = vld [vmem:[#allocation2] sm:$0xff] }
 0x1f0   :  { %v624_v27 = vcombine.high %v404_v26, %v404_v26  ;;  %v623_v28 = vcombine.low %v404_v26, %v404_v26 }
 0x1f2   :  { %638 = vmatprep.mubr.msk.bf16.mxu0 %vm109_vm1, %v624_v27 }
 0x1f3   :  { %557 = vmatmul.mubr.bf16.vlgmr.msra.gmra.mrb[4].mxu0 %v623_v28 }
 0x2c6   :  { %v558_v33 = vpop.f32.mrb[4].mxu0 }
 0x2c7   :  { %v559_v34 = vadd.f32 %v622_v31, %v558_v33  ;;  %v560_v35 = vpop.f32.mrb[5].mxu0 }
 0x2c8   :  { %v561_v36 = vpop.f32.mrb[6].mxu0 }
 0x2c9   :  { %v570_v37 = vadd.f32 %v569_v32, %v559_v34  ;;  %v562_v38 = vpop.f32.mrb[7].mxu0 }
 0x2cb   :  { %572 = vst.msk [vmem:[%s921_s7] sm:$0xff] %vm571_vm4, %v570_v37 }
 0x2cc   :  { %577 = vsyncpa [#allocation4], 1 }

</bundles_post_ra>
